<compile_context>
chip_gen: v7x
topology: tpu7x:2x2x1
jax: 0.10.0
libtpu: 0.0.40
codegen_flags: <defaults>
</compile_context>

<pallas_src>
import jax
import jax.numpy as jnp
from jax import lax
from jax.experimental import pallas as pl
from jax.experimental.pallas import tpu as pltpu

_LANE = 128
_SUBLANE = 8


def _round_up(x, m):
    return ((x + m - 1) // m) * m


def _round_down(x, m):
    return (x // m) * m


def _vmem_cap_bytes():
    """Physical VMEM per core; conservative (v7x-sized) fallback."""
    try:
        info = pltpu.get_tpu_info()
        cap = getattr(info, "vmem_capacity_bytes", None)
        if cap:
            return int(cap)
    except Exception:
        pass
    return 64 * 1024 * 1024


def _make_kernel(*, n_outputs, k_total, tk, k_tiled, transpose_out):
    prec = lax.Precision.HIGHEST  # mem-bound kernel; extra MXU passes are free

    def finalize(logits, b_ref, o_ref):
        # logits: (tm, no_pad) f32
        if transpose_out:
            # (tm, 128*m) -> (128*m, tm): natively (8,128)-aligned XLU transpose.
            # Slice the real outputs, add bias, sigmoid on the small slice only.
            lt = jnp.transpose(logits, (1, 0))[:n_outputs, :]     # (n_outputs, tm)
            o_ref[...] = jax.nn.sigmoid(lt + b_ref[...]).astype(o_ref.dtype)
        else:
            o_ref[...] = jax.nn.sigmoid(logits + b_ref[...]).astype(o_ref.dtype)

    if not k_tiled:
        def kernel(x_ref, w_ref, b_ref, o_ref):
            logits = lax.dot_general(
                x_ref[...], w_ref[...],
                dimension_numbers=(((1,), (0,)), ((), ())),
                preferred_element_type=jnp.float32, precision=prec)
            finalize(logits, b_ref, o_ref)
        return kernel

    ragged_k = (k_total % tk) != 0

    def kernel(x_ref, w_ref, b_ref, o_ref, acc_ref):
        k = pl.program_id(1)

        @pl.when(k == 0)
        def _():
            acc_ref[...] = jnp.zeros_like(acc_ref)

        x = x_ref[...]
        w = w_ref[...]
        if ragged_k:
            # Last K block runs past the arrays; OOB columns/rows hold garbage
            # (possibly NaN/Inf), so zero BOTH operands there before the dot.
            rem = k_total - k * tk
            xm = lax.broadcasted_iota(jnp.int32, x.shape, 1) < rem
            wm = lax.broadcasted_iota(jnp.int32, w.shape, 0) < rem
            x = jnp.where(xm, x, jnp.zeros_like(x))
            w = jnp.where(wm, w, jnp.zeros_like(w))

        acc_ref[...] += lax.dot_general(
            x, w, dimension_numbers=(((1,), (0,)), ((), ())),
            preferred_element_type=jnp.float32, precision=prec)

        @pl.when(k == pl.num_programs(1) - 1)
        def _():
            finalize(acc_ref[...], b_ref, o_ref)

    return kernel


def logistic_regression(x, weight, bias, *, k_block=None, x_tile_bytes=None):
    """sigmoid(x @ weight.T + bias), matching torch.sigmoid(nn.Linear(...)(x))."""
    B, K = x.shape
    n_outputs = weight.shape[0]
    assert weight.shape == (n_outputs, K) and bias.shape == (n_outputs,)
    out_dtype = x.dtype
    itemsize = jnp.dtype(x.dtype).itemsize
    w_itemsize = jnp.dtype(weight.dtype).itemsize
    o_itemsize = jnp.dtype(out_dtype).itemsize

    # ---- per-generation budgets ---------------------------------------------
    vmem_cap = _vmem_cap_bytes()
    # 48 MiB scoped limit on v7x-class (64 MiB physical), 96 MiB on v5e/v6e.
    vmem_limit = min(vmem_cap * 3 // 4, 112 * 1024 * 1024)
    if x_tile_bytes is None:
        # v7x (less VMEM but ~3.2 TB/s/TC) wants bigger steps; v5e/v6e ~8 MiB.
        x_tile_bytes = 12 * 1024 * 1024 if vmem_cap <= 64 * 1024 * 1024 else 8 * 1024 * 1024

    # ---- output layout --------------------------------------------------------
    transpose_out = n_outputs < _LANE
    # Pad output features to 128 in the transposed path: same vregs / VMEM /
    # MXU passes as n_outputs (lane padding), but the logits transpose becomes
    # a fully aligned (8,128) shape and the weight load stays a one-time cost.
    no_pad = _round_up(n_outputs, _LANE) if transpose_out else n_outputs

    # Weight pre-transposed to (K, no_pad): natural A @ B contraction, resident.
    w_t = jnp.pad(weight.T, ((0, 0), (0, no_pad - n_outputs)))
    if transpose_out:
        bias_arr = bias.reshape(n_outputs, 1).astype(jnp.float32)
    else:
        bias_arr = bias.reshape(1, n_outputs).astype(jnp.float32)

    # ---- K tiling decision ----------------------------------------------------
    k_lane = _round_up(K, _LANE)                       # lane-padded K in VMEM
    if k_block is not None:
        tk = min(_round_up(k_block, _LANE), k_lane)
    elif k_lane * itemsize > 16 * 1024:                # >16 KiB per x row
        tk = 2048
    else:
        tk = k_lane
    k_tiled = tk < k_lane
    if not k_tiled:
        tk = K                                         # full-K block (== array dim)

    # ---- batch tile from byte budget -----------------------------------------
    kdim = tk if k_tiled else K
    kdim_lane = _round_up(kdim, _LANE)
    no_lane = _round_up(no_pad, _LANE)
    no_sub = _round_up(n_outputs, _SUBLANE)

    per_row = 2 * kdim_lane * itemsize                     # double-buffered x tile
    per_row += no_lane * 4                                 # f32 logits / accumulator
    per_row += 2 * (no_sub if transpose_out else no_lane) * o_itemsize  # out tiles
    fixed = 2 * _round_up(kdim, _SUBLANE) * no_lane * w_itemsize        # resident w
    fixed += 2 * _SUBLANE * no_lane * 4                                 # bias
    fixed += 2 * 1024 * 1024                                            # transients

    budget = int(vmem_limit * 0.85)
    tm_cap = max(_LANE, max(budget - fixed, 0) // per_row)
    tm = min(max(_LANE, x_tile_bytes // (kdim_lane * itemsize)), tm_cap)

    small_batch = B < _LANE
    if small_batch:
        b_work = _round_up(B, _SUBLANE)     # pad a handful of rows (negligible)
        tm = b_work
        if b_work != B:
            x = jnp.pad(x, ((0, b_work - B), (0, 0)))
    else:
        b_work = B
        tm = max(_LANE, _round_down(tm, _LANE))
        tm = min(tm, _round_down(B, _LANE))            # block never exceeds array
        if B >= 2 * _LANE:
            # >= 2 grid steps so ("parallel",) can use both v7x TensorCores.
            tm = min(tm, _round_up((B + 1) // 2, _LANE))

    nb = pl.cdiv(b_work, tm)

    # ---- grid / specs ---------------------------------------------------------
    if k_tiled:
        nk = pl.cdiv(K, tk)
        grid = (nb, nk)
        x_spec = pl.BlockSpec((tm, tk), lambda i, k: (i, k))
        w_spec = pl.BlockSpec((tk, no_pad), lambda i, k: (k, 0))
        b_map = lambda i, k: (0, 0)
        o_map_t = lambda i, k: (0, i)
        o_map_d = lambda i, k: (i, 0)
        scratch = [pltpu.VMEM((tm, no_pad), jnp.float32)]
        dims = ("parallel", "arbitrary")
    else:
        grid = (nb,)
        x_spec = pl.BlockSpec((tm, K), lambda i: (i, 0))
        w_spec = pl.BlockSpec((K, no_pad), lambda i: (0, 0))
        b_map = lambda i: (0, 0)
        o_map_t = lambda i: (0, i)
        o_map_d = lambda i: (i, 0)
        scratch = []
        dims = ("parallel",)

    if transpose_out:
        out_shape = jax.ShapeDtypeStruct((n_outputs, b_work), out_dtype)
        o_spec = pl.BlockSpec((n_outputs, tm), o_map_t)
        b_spec = pl.BlockSpec((n_outputs, 1), b_map)
    else:
        out_shape = jax.ShapeDtypeStruct((b_work, n_outputs), out_dtype)
        o_spec = pl.BlockSpec((tm, n_outputs), o_map_d)
        b_spec = pl.BlockSpec((1, n_outputs), b_map)

    kernel = _make_kernel(n_outputs=n_outputs, k_total=K, tk=tk,
                          k_tiled=k_tiled, transpose_out=transpose_out)

    cost = pl.CostEstimate(
        flops=2 * b_work * K * n_outputs,
        transcendentals=b_work * n_outputs,
        bytes_accessed=itemsize * b_work * K + w_itemsize * K * n_outputs
                       + o_itemsize * b_work * n_outputs)

    out = pl.pallas_call(
        kernel,
        out_shape=out_shape,
        grid_spec=pltpu.PrefetchScalarGridSpec(
            num_scalar_prefetch=0,
            grid=grid,
            in_specs=[x_spec, w_spec, b_spec],
            out_specs=o_spec,
            scratch_shapes=scratch),
        compiler_params=pltpu.CompilerParams(
            dimension_semantics=dims,
            vmem_limit_bytes=int(vmem_limit)),
        cost_estimate=cost,
    )(x, w_t, bias_arr)

    if transpose_out:
        if b_work != B:
            out = out[:, :B]
        return out.T            # free reshape for n_outputs == 1
    if b_work != B:
        out = out[:B]
    return out


def _reference(x, weight, bias):
    return jax.nn.sigmoid(
        jnp.dot(x, weight.T, precision=lax.Precision.HIGHEST) + bias)


if __name__ == "__main__":
    key = jax.random.PRNGKey(0)
    ks = jax.random.split(key, 9)

    def make_case(kx, kw, kb, batch, n_inputs, n_outputs):
        bound = 1.0 / (n_inputs ** 0.5)
        x = jax.random.normal(kx, (batch, n_inputs), dtype=jnp.float32)
        w = jax.random.uniform(kw, (n_outputs, n_inputs),
                               minval=-bound, maxval=bound, dtype=jnp.float32)
        b = jax.random.uniform(kb, (n_outputs,),
                               minval=-bound, maxval=bound, dtype=jnp.float32)
        return x, w, b

    # Case 1: canonical module shape (n_outputs=1), small batch path.
    x1, w1, b1 = make_case(ks[0], ks[1], ks[2], batch=16, n_inputs=32, n_outputs=1)
    o1 = jax.block_until_ready(logistic_regression(x1, w1, b1))
    r1 = _reference(x1, w1, b1)
    assert o1.shape == (16, 1)
    assert jnp.allclose(o1, r1, atol=2e-5, rtol=2e-5)

    # Case 2: multi-output, ragged batch (B not a multiple of the 128-row tile).
    x2, w2, b2 = make_case(ks[3], ks[4], ks[5], batch=200, n_inputs=64, n_outputs=4)
    o2 = jax.block_until_ready(logistic_regression(x2, w2, b2))
    r2 = _reference(x2, w2, b2)
    assert o2.shape == (200, 4)
    assert jnp.allclose(o2, r2, atol=2e-5, rtol=2e-5)

    # Case 3: K-tiled accumulator path with ragged K and ragged batch
    # (k_block override exercises the large-n_inputs code path at small scale).
    x3, w3, b3 = make_case(ks[6], ks[7], ks[8], batch=144, n_inputs=320, n_outputs=3)
    o3 = jax.block_until_ready(logistic_regression(x3, w3, b3, k_block=128))
    r3 = _reference(x3, w3, b3)
    assert o3.shape == (144, 3)
    assert jnp.allclose(o3, r3, atol=2e-5, rtol=2e-5)

    print("KERNEL_OK")
</pallas_src>

<mosaic_0001>
module attributes {stable_mosaic.version = 11 : i64} {
  func.func @kernel(%arg0: i32, %arg1: memref<16x32xf32, #tpu.memory_space<vmem>>, %arg2: memref<32x128xf32, #tpu.memory_space<vmem>>, %arg3: memref<1x1xf32, #tpu.memory_space<vmem>>, %arg4: memref<1x16xf32, #tpu.memory_space<vmem>>) attributes {dimension_semantics = [#tpu.dimension_semantics<parallel>], iteration_bounds = array<i64: 1>, scalar_prefetch = 0 : i64, scratch_operands = 0 : i64, tpu.core_type = #tpu.core_type<tc>, window_params = [{transform_indices = @transform_0, window_bounds = array<i64: 16, 32>}, {pipeline_mode = #tpu.pipeline_mode<synchronous>, transform_indices = @transform_1, window_bounds = array<i64: 32, 128>}, {pipeline_mode = #tpu.pipeline_mode<synchronous>, transform_indices = @transform_2, window_bounds = array<i64: 1, 1>}, {transform_indices = @transform_3, window_bounds = array<i64: 1, 16>}]} {
    %c0 = arith.constant 0 : index
    %c0_0 = arith.constant 0 : index
    %0 = vector.load %arg1[%c0, %c0_0] : memref<16x32xf32, #tpu.memory_space<vmem>>, vector<16x32xf32>
    %c0_1 = arith.constant 0 : index
    %c0_2 = arith.constant 0 : index
    %1 = vector.load %arg2[%c0_1, %c0_2] : memref<32x128xf32, #tpu.memory_space<vmem>>, vector<32x128xf32>
    %cst = arith.constant dense<0.000000e+00> : vector<16x128xf32>
    %2 = tpu.matmul %0, %1, %cst {dimension_numbers = #tpu.dot_dimension_numbers<[1], [0], [0], [1], [0, 0, 1, 1], [], []>, precision = #tpu.contract_precision<fp32>} : vector<16x32xf32>, vector<32x128xf32>, vector<16x128xf32> -> vector<16x128xf32>
    %3 = tpu.transpose %2, [1, 0] : vector<16x128xf32> -> vector<128x16xf32>
    %4 = vector.extract_strided_slice %3 {offsets = [0, 0], sizes = [1, 16], strides = [1, 1]} : vector<128x16xf32> to vector<1x16xf32>
    %c0_3 = arith.constant 0 : index
    %c0_4 = arith.constant 0 : index
    %5 = vector.load %arg3[%c0_3, %c0_4] : memref<1x1xf32, #tpu.memory_space<vmem>>, vector<1x1xf32>
    %6 = vector.broadcast %5 : vector<1x1xf32> to vector<1x16xf32>
    %7 = arith.addf %4, %6 : vector<1x16xf32>
    %8 = arith.negf %7 : vector<1x16xf32>
    %9 = math.exp %8 : vector<1x16xf32>
    %cst_5 = arith.constant 1.000000e+00 : f32
    %10 = vector.broadcast %cst_5 : f32 to vector<1x16xf32>
    %11 = arith.addf %10, %9 : vector<1x16xf32>
    %12 = arith.divf %10, %11 : vector<1x16xf32>
    %c0_6 = arith.constant 0 : index
    %c0_7 = arith.constant 0 : index
    %13 = vector.load %arg4[%c0_6, %c0_7] : memref<1x16xf32, #tpu.memory_space<vmem>>, vector<1x16xf32>
    tpu.vector_store %arg4[%c0_6, %c0_7], %12 {strides = array<i32>} : memref<1x16xf32, #tpu.memory_space<vmem>>, vector<1x16xf32>,
    return
  }
  func.func @transform_0(%arg0: i32) -> (i32, i32) {
    %c0_i32 = arith.constant 0 : i32
    %c0_i32_0 = arith.constant 0 : i32
    return %arg0, %c0_i32 : i32, i32
  }
  func.func @transform_1(%arg0: i32) -> (i32, i32) {
    %c0_i32 = arith.constant 0 : i32
    %c0_i32_0 = arith.constant 0 : i32
    %c0_i32_1 = arith.constant 0 : i32
    return %c0_i32, %c0_i32_0 : i32, i32
  }
  func.func @transform_2(%arg0: i32) -> (i32, i32) {
    %c0_i32 = arith.constant 0 : i32
    %c0_i32_0 = arith.constant 0 : i32
    %c0_i32_1 = arith.constant 0 : i32
    return %c0_i32, %c0_i32_0 : i32, i32
  }
  func.func @transform_3(%arg0: i32) -> (i32, i32) {
    %c0_i32 = arith.constant 0 : i32
    %c0_i32_0 = arith.constant 0 : i32
    return %c0_i32, %arg0 : i32, i32
  }
}

</mosaic_0001>

<bundles_post_ra>
// kernel: tpu_custom_call.1
= control target key start
LH: loop header
LB: loop body
LE: loop exit
PB: predicated region body
PF: predicated region fallthrough
CT: control target
= control target key end

     0   :  { %s975_s0 = inlined_call_operand.hbm [shape: f32[16,32], index: 0, kind: input, shape index: {}]   ;;  %s976_s1 = inlined_call_operand.hbm [shape: f32[32,128], index: 1, kind: input, shape index: {}]   ;;  %s977_s2 = inlined_call_operand.<no memory space> [shape: f32[1,1], index: 2, kind: input, shape index: {}]   ;;  %s978_s3 = inlined_call_operand.hbm [shape: f32[1,16], index: 3, kind: output, shape index: {}]  }
   0x1   :  { %v8_v0 = vstv %s977_s2 }
   0x2   :  { %9 = vst [vmem:[#allocation2] sm:$0x1] %v8_v0 }
   0x3   :  { %10 = vsyncpa [#allocation4], 0 }
   0x4   :  { %11 = vsyncpa [#allocation7], 0 }
   0x5   :  { %12 = vsyncpa [#allocation5], 0  ;;  %s898_s14 = smov [#allocation3]   ;;  %s826_s18 = scalar_lea.hbm %s975_s0, 256 }
   0x6   :  { %s18_s15 = sshll.u32 %s898_s14, 4  ;;  %p827_p0 = scmp.ne.s32.totalorder %s975_s0, %s826_s18  ;;  %s19_s15 = int_to_ptr.vmem [resolvable:$true] %s18_s15 }
   0x7   :  { %p830_p1 = scmp.lt.u32.totalorder %s826_s18, %s975_s0 }
   0x9   :  { %p832_p2 = pnand %p830_p1, %p827_p0 }
   0xb   :  { %835 = shalt.err (!%p832_p2)
}
   0xc   :  { %s836_s2 = scalar_lea.vmem %s19_s15, 256  ;;  %p841_p4 = scmp.lt.s32.totalorder %s19_s15, %s19_s15 }
   0xd   :  { %p837_p3 = scmp.ne.s32.totalorder %s19_s15, %s836_s2  ;;  %p842_p5 = scmp.lt.s32.totalorder %s836_s2, %s836_s2 }
   0xf   :  { %p843_p6 = por %p842_p5, %p841_p4 }
  0x11   :  { %p844_p7 = pnand %p843_p6, %p837_p3 }
  0x13   :  { %847 = shalt.err (!%p844_p7)
}
  0x14   :  { %s899_s23 = smov 128   ;;  %s900_s24 = smov 8  }
  0x15   :  { %24 = dma.hbm_to_vmem [thread:$0]  %s975_s0, 256, %s19_s15, [#allocation4], %s899_s23, %s899_s23, %s900_s24  }
  0x16   :  { %s901_s27 = smov [#allocation6]   ;;  %s848_s4 = scalar_lea.hbm %s976_s1, 512 }
  0x17   :  { %s30_s28 = sshll.u32 %s901_s27, 4  ;;  %p849_p8 = scmp.ne.s32.totalorder %s976_s1, %s848_s4  ;;  %s31_s28 = int_to_ptr.vmem [resolvable:$true] %s30_s28 }
  0x18   :  { %p852_p9 = scmp.lt.u32.totalorder %s848_s4, %s976_s1 }
  0x1a   :  { %p854_p10 = pnand %p852_p9, %p849_p8 }
  0x1c   :  { %857 = shalt.err (!%p854_p10)
}
  0x1d   :  { %s858_s9 = scalar_lea.vmem %s31_s28, 512  ;;  %p863_p12 = scmp.lt.s32.totalorder %s31_s28, %s31_s28 }
  0x1e   :  { %p859_p11 = scmp.ne.s32.totalorder %s31_s28, %s858_s9  ;;  %p864_p13 = scmp.lt.s32.totalorder %s858_s9, %s858_s9 }
  0x20   :  { %p865_p0 = por %p864_p13, %p863_p12 }
  0x22   :  { %p866_p1 = pnand %p865_p0, %p859_p11 }
  0x24   :  { %869 = shalt.err (!%p866_p1)
}
  0x25   :  { %36 = dma.hbm_to_vmem [thread:$0]  %s976_s1, 512, %s31_s28, [#allocation7], %s899_s23, %s899_s23, %s900_s24  }
  0x26   :  { %892 = dma.done.wait [#allocation4], 256  }
  0x27   :  { %893 = vsyncadd [#allocation4], 4294967040 }
  0x28   :  { %894 = dma.done.wait [#allocation7], 512  }
  0x29   :  { %895 = vsyncadd [#allocation7], 4294966784  ;;  %v902_v1 = vmov 0   ;;  %vm51_vm0 = vcmask 261120   ;;  %v47_v2 = vld [vmem:[#allocation6] sm:$0xff]  ;;  %v48_v3 = vld [vmem:[#allocation6 + $0x8] sm:$0xff]  ;;  %v624_v55 = vlaneseq }
  0x2a   :  { %821 = vset.pattern.permute.xlu0 %v902_v1  ;;  %v49_v4 = vld [vmem:[#allocation6 + $0x10] sm:$0xff]  ;;  %v59_v5 = vand.u32 4294901760, %v47_v2  ;;  %v62_v6 = vand.u32 4294901760, %v48_v3  ;;  %v50_v7 = vld [vmem:[#allocation6 + $0x18] sm:$0xff]  ;;  %v618_v14 = vld [vmem:[#allocation2] sm:$0x1] }
  0x2b   :  { %v65_v8 = vand.u32 4294901760, %v49_v4  ;;  %v45_v9 = vld [vmem:[#allocation3] sm:$0xff]  ;;  %v46_v10 = vld [vmem:[#allocation3 + $0x8] sm:$0xff]  ;;  %v68_v11 = vand.u32 4294901760, %v50_v7  ;;  %621 = vperm.xlu0 %821, %v618_v14   ;;  %v625_v56 = vshrl.u32 %v624_v55, 7  ;;  %s903_s1 = smov [#allocation8]  }
  0x2c   :  { %v53_v12 = vsel %vm51_vm0, %v45_v9, 0  ;;  %v56_v13 = vsel %vm51_vm0, %v46_v10, 0  ;;  %v756_v15 = vpack.c.bf16 %v62_v6, %v59_v5  ;;  %v149_v18 = vsub.f32 %v47_v2, %v59_v5  ;;  %s643_s11 = sshll.u32 %s903_s1, 4  ;;  %s644_s11 = int_to_ptr.vmem [resolvable:$true] %s643_s11 }
  0x2d   :  { %v951_v16 = vand.u32 4294901760, %v53_v12  ;;  %v953_v17 = vand.u32 4294901760, %v56_v13  ;;  %v760_v19 = vpack.c.bf16 %v68_v11, %v65_v8  ;;  %v156_v20 = vsub.f32 %v48_v3, %v62_v6  ;;  %s870_s12 = scalar_lea.vmem %s644_s11, 16  ;;  %s874_s13 = scalar_lea.vmem %s644_s11, 32 }
  0x2e   :  { %v163_v21 = vsub.f32 %v49_v4, %v65_v8  ;;  %v170_v22 = vsub.f32 %v50_v7, %v68_v11  ;;  %757 = vmatprep.subr.bf16.mxu1 %v756_v15  ;;  %781 = vmatprep.subr.bf16.mxu0 %v756_v15  ;;  %v150_v25 = vand.u32 4294901760, %v149_v18  ;;  %v626_v57 = vsub.s32 0, %v625_v56  ;;  %p871_p2 = scmp.ne.s32.totalorder %s644_s11, %s870_s12  ;;  %p875_p3 = scmp.lt.s32.totalorder %s644_s11, %s644_s11 }
  0x2f   :  { %v128_v23 = vsub.f32 %v53_v12, %v951_v16  ;;  %v138_v24 = vsub.f32 %v56_v13, %v953_v17  ;;  %759 = vmatpush3.bf16.msra.mxu1 %v756_v15  ;;  %783 = vmatpush3.bf16.msra.mxu0 %v756_v15  ;;  %v157_v26 = vand.u32 4294901760, %v156_v20  ;;  %v772_v47 = vpack.c.bf16 %v156_v20, %v149_v18  ;;  %p876_p4 = scmp.lt.s32.totalorder %s874_s13, %s870_s12 }
  0x30   :  { %v164_v27 = vand.u32 4294901760, %v163_v21  ;;  %v171_v28 = vand.u32 4294901760, %v170_v22  ;;  %761 = vmatprep.subr.bf16.mxu1 %v760_v19  ;;  %785 = vmatprep.subr.bf16.mxu0 %v760_v19  ;;  %v151_v31 = vsub.f32 %v149_v18, %v150_v25  ;;  %v776_v48 = vpack.c.bf16 %v170_v22, %v163_v21 }
  0x31   :  { %v129_v29 = vand.u32 4294901760, %v128_v23  ;;  %v139_v30 = vand.u32 4294901760, %v138_v24  ;;  %v158_v32 = vsub.f32 %v156_v20, %v157_v26  ;;  %v788_v33 = vpack.c.bf16 %v157_v26, %v150_v25  ;;  %p877_p5 = por %p876_p4, %p875_p3 }
  0x32   :  { %v165_v34 = vsub.f32 %v163_v21, %v164_v27  ;;  %v172_v35 = vsub.f32 %v170_v22, %v171_v28  ;;  %v152_v38 = vand.u32 4294901760, %v151_v31  ;;  %v792_v46 = vpack.c.bf16 %v171_v28, %v164_v27 }
  0x33   :  { %v130_v36 = vsub.f32 %v128_v23, %v129_v29  ;;  %731 = vmatprep.mubr.f32.mxu0 %v129_v29  ;;  %v140_v37 = vsub.f32 %v138_v24, %v139_v30  ;;  %763 = vmatpush3.bf16.msra.mxu1 %v760_v19  ;;  %v159_v39 = vand.u32 4294901760, %v158_v32  ;;  %vm635_vm1 = vcmask 122880   ;;  %p878_p6 = pnand %p877_p5, %p871_p2 }
  0x34   :  { %787 = vmatpush3.bf16.msra.mxu0 %v760_v19  ;;  %v166_v40 = vand.u32 4294901760, %v165_v34  ;;  %v173_v41 = vand.u32 4294901760, %v172_v35 }
  0x35   :  { %v131_v42 = vand.u32 4294901760, %v130_v36  ;;  %v141_v43 = vand.u32 4294901760, %v140_v37  ;;  %789 = vmatprep.subr.bf16.mxu0 %v788_v33  ;;  %v764_v44 = vpack.c.bf16 %v159_v39, %v152_v38 }
  0x36   :  { %v768_v45 = vpack.c.bf16 %v173_v41, %v166_v40 }
  0x37   :  { %698 = vmatprep.mubr.f32.mxu1 %v131_v42  ;;  %732 = vmatmul.mubr.f32.vlgmr.msra.gmra.mrb[0].mxu0 %v139_v30 }
  0x38   :  { %699 = vmatmul.mubr.f32.vlgmr.msra.gmra.mrb[0].mxu1 %v141_v43  ;;  %765 = vmatprep.subr.bf16.mxu1 %v764_v44 }
  0x39   :  { %767 = vmatpush3.bf16.msra.mxu1 %v764_v44  ;;  %791 = vmatpush3.bf16.msra.mxu0 %v788_v33 }
  0x3a   :  { %769 = vmatprep.subr.bf16.mxu1 %v768_v45  ;;  %793 = vmatprep.subr.bf16.mxu0 %v792_v46 }
  0x3b   :  { %709 = vmatprep.mubr.f32.mxu1 %v951_v16  ;;  %742 = vmatprep.mubr.f32.mxu0 %v951_v16 }
  0x3d   :  { %771 = vmatpush3.bf16.msra.mxu1 %v768_v45  ;;  %795 = vmatpush3.bf16.msra.mxu0 %v792_v46 }
  0x3e   :  { %773 = vmatprep.subr.bf16.mxu1 %v772_v47  ;;  %797 = vmatprep.subr.bf16.mxu0 %v756_v15 }
  0x40   :  { %710 = vmatmul.mubr.f32.vlgmr.msra.gmra.mrb[0].mxu1 %v953_v17  ;;  %743 = vmatmul.mubr.f32.vlgmr.msra.gmra.mrb[0].mxu0 %v953_v17 }
  0x41   :  { %775 = vmatpush3.bf16.msra.mxu1 %v772_v47  ;;  %799 = vmatpush3.bf16.msra.mxu0 %v756_v15 }
  0x42   :  { %777 = vmatprep.subr.bf16.mxu1 %v776_v48  ;;  %801 = vmatprep.subr.bf16.mxu0 %v760_v19 }
  0x43   :  { %720 = vmatprep.mubr.f32.mxu1 %v128_v23  ;;  %753 = vmatprep.mubr.f32.mxu0 %v951_v16 }
  0x45   :  { %779 = vmatpush3.bf16.msra.mxu1 %v776_v48  ;;  %803 = vmatpush3.bf16.msra.mxu0 %v760_v19 }
  0x48   :  { %721 = vmatmul.mubr.f32.vlgmr.msra.gmra.mrb[0].mxu1 %v138_v24  ;;  %754 = vmatmul.mubr.f32.vlgmr.msra.gmra.mrb[0].mxu0 %v953_v17 }
  0xaa   :  { %v622_v58 = vpop.permute.xlu0 %621 }
  0xab   :  { %v627_v59 = vrot.slane %v622_v58, %v626_v57 }
 0x11b   :  { %v722_v49 = vpop.f32.mrb[0].mxu1  ;;  %v755_v50 = vpop.f32.mrb[0].mxu0 }
 0x11c   :  { %v804_v51 = vadd.f32 %v755_v50, %v722_v49  ;;  %v320_v52 = vpop.f32.mrb[1].mxu1  ;;  %v576_v53 = vpop.f32.mrb[1].mxu0 }
 0x11d   :  { %v805_v54 = vadd.f32 %v576_v53, %v320_v52 }
 0x11f   :  { %586 = vxpose.xlu0.b32.start [1/2] (short) (narrow) %v805_v54, 8 }
 0x123   :  { %587 = vxpose.xlu0.b32.end [2/2] (short) (narrow) %v804_v51, 8 }
 0x19f   :  { %v602_v60 = vpop.trf.xlu0 }
 0x1a0   :  { %v628_v61 = vadd.f32 %v627_v59, %v602_v60 }
 0x1a2   :  { %v653_v62 = vmul.f32 -1.442695, %v628_v61 }
 0x1a4   :  { %822 = vpow2.f32 %v653_v62 }
 0x1ae   :  { %v823_v63 = vpop.eup %822 }
 0x1af   :  { %v632_v0 = vadd.f32 1.0, %v823_v63 }
 0x1b1   :  { %824 = vrcp.f32 %v632_v0 }
 0x1bb   :  { %v825_v1 = vpop.eup %824 }
 0x1bc   :  { %636 = vst.msk [vmem:[#allocation8] sm:$0x1] %vm635_vm1, %v825_v1 }
 0x1bd   :  { %881 = shalt.err (!%p878_p6)
}
 0x1be   :  { %s882_s16 = scalar_lea.hbm %s978_s3, 16 }
 0x1bf   :  { %p883_p7 = scmp.ne.s32.totalorder %s978_s3, %s882_s16  ;;  %p886_p8 = scmp.lt.u32.totalorder %s882_s16, %s978_s3 }
 0x1c1   :  { %p888_p9 = pnand %p886_p8, %p883_p7 }
 0x1c3   :  { %891 = shalt.err (!%p888_p9)
}
 0x1c4   :  { %646 = dma.vmem_to_hbm [thread:$0]  %s644_s11, 16, %s978_s3, [#allocation5]  }
 0x1c5   :  { %896 = dma.done.wait [#allocation5], 16  }
 0x1c6   :  { %897 = vsyncadd [#allocation5], 4294967280 }
 0x1c7   :  { %650 = vsyncpa [#allocation4], 1 }
 0x1c8   :  { %651 = vsyncpa [#allocation7], 1 }
 0x1c9   :  { %652 = vsyncpa [#allocation5], 1 }

</bundles_post_ra>
